<compile_context>
chip_gen: v7x
topology: tpu7x:2x2x1
jax: 0.10.0
libtpu: 0.0.40
codegen_flags: <defaults>
</compile_context>

<pallas_src>
import numpy as np
import jax
import jax.numpy as jnp
from jax import lax
from jax.experimental import pallas as pl
from jax.experimental.pallas import tpu as pltpu


# --------------------------- L2-normalize kernel -----------------------------
def _normalize_kernel(x_ref, o_ref):
    x = x_ref[...].astype(jnp.float32)
    ss = jnp.sum(x * x, axis=1, keepdims=True)
    # F.normalize(x, dim=1): x / max(||x||, 1e-12) == x * rsqrt(max(ss, 1e-24))
    inv = lax.rsqrt(jnp.maximum(ss, 1e-24))
    o_ref[...] = (x * inv).astype(o_ref.dtype)


def _l2_normalize(x, out_dtype, block_rows):
    b_pad, d = x.shape
    return pl.pallas_call(
        _normalize_kernel,
        out_shape=jax.ShapeDtypeStruct((b_pad, d), out_dtype),
        grid=(b_pad // block_rows,),
        in_specs=[pl.BlockSpec((block_rows, d), lambda i: (i, 0))],
        out_specs=pl.BlockSpec((block_rows, d), lambda i: (i, 0)),
        compiler_params=pltpu.CompilerParams(dimension_semantics=("parallel",)),
    )(x)


# ------------------------------- loss kernel ---------------------------------
def _make_loss_kernel(temperature, factor, tm, chunk, b_real):
    inv_temp = 1.0 / float(temperature)
    factor = float(factor)

    def kernel(vn_ref, tn_ref, ids_row_ref, ids_col_ref, out_ref, s_scr, e_scr):
        i = pl.program_id(0)
        row_start = pl.multiple_of(i * tm, tm)
        bp = s_scr.shape[1]
        nch = bp // chunk                      # static chunk count

        ids_r = ids_row_ref[...]               # (TM, 1) int32 anchor ids
        row_valid = (lax.broadcasted_iota(jnp.int32, (tm, 1), 0) + row_start) < b_real

        v_tile = vn_ref[pl.ds(row_start, tm), :]   # (TM, D) anchor slice
        t_tile = tn_ref[pl.ds(row_start, tm), :]   # (TM, D) anchor slice

        def masks(c0):
            # In-kernel mask build for one column chunk (no (B,B) DMA anywhere).
            ids_c = ids_col_ref[:, pl.ds(c0, chunk)]                # (1, CH)
            match = ids_r == ids_c                                  # (TM, CH)
            col_valid = (lax.broadcasted_iota(jnp.int32, (tm, chunk), 1) + c0) < b_real
            pm = (match & col_valid & row_valid).astype(jnp.float32)
            nm = ((~match) & col_valid).astype(jnp.float32)
            return pm, nm

        zeros = jnp.zeros((tm, 1), jnp.float32)

        def directional(anchor, other_ref):
            # ---- pass 1: chunked MXU sims -> s_scr; pos/neg stats; row max.
            def p1(c, carry):
                pos_sum, pos_cnt, neg_cnt, mraw = carry
                c0 = pl.multiple_of(c * chunk, chunk)
                oth = other_ref[pl.ds(c0, chunk), :]                # (CH, D)
                s_c = lax.dot_general(anchor, oth, (((1,), (1,)), ((), ())),
                                      preferred_element_type=jnp.float32)
                s_scr[:, pl.ds(c0, chunk)] = s_c
                pm, nm = masks(c0)
                pos_sum = pos_sum + jnp.sum(s_c * pm, axis=1, keepdims=True)
                pos_cnt = pos_cnt + jnp.sum(pm, axis=1, keepdims=True)
                neg_cnt = neg_cnt + jnp.sum(nm, axis=1, keepdims=True)
                mraw = jnp.maximum(mraw, jnp.max(s_c, axis=1, keepdims=True))
                return pos_sum, pos_cnt, neg_cnt, mraw

            init = (zeros, zeros, zeros, jnp.full((tm, 1), -1e30, jnp.float32))
            pos_sum, pos_cnt, neg_cnt, mraw = lax.fori_loop(0, nch, p1, init)

            mean_pos = pos_sum / jnp.maximum(pos_cnt, 1.0)
            m = mraw * inv_temp                                     # row max of s/T
            valid = ((pos_cnt > 0.5) & (neg_cnt > 0.5)).astype(jnp.float32)

            # ---- pass 2: weighted negative exponentials (online); e -> e_scr.
            def p2(c, neg_acc):
                c0 = pl.multiple_of(c * chunk, chunk)
                s_c = s_scr[:, pl.ds(c0, chunk)]
                _, nm = masks(c0)
                e_c = jnp.exp(s_c * inv_temp - m)
                e_scr[:, pl.ds(c0, chunk)] = e_c
                if factor != 1.0:
                    # semi-hard: negatives with mean_pos-0.2 < sim < mean_pos
                    semi = ((s_c < mean_pos) & (s_c > mean_pos - 0.2)).astype(jnp.float32)
                    w = nm + (factor - 1.0) * (nm * semi)
                else:
                    w = nm
                return neg_acc + jnp.sum(e_c * w, axis=1, keepdims=True)

            neg_acc = lax.fori_loop(0, nch, p2, zeros)

            # ---- pass 3: per-positive log terms (pm * log(e_p + neg_total)).
            def p3(c, acc):
                c0 = pl.multiple_of(c * chunk, chunk)
                e_c = e_scr[:, pl.ds(c0, chunk)]
                pm, _ = masks(c0)
                return acc + jnp.sum(pm * jnp.log(e_c + neg_acc), axis=1, keepdims=True)

            pos_log = lax.fori_loop(0, nch, p3, zeros)

            # Hoisted:  sum_p (m - s_p/T) = pos_cnt*m - pos_sum/T
            row_total = pos_log + pos_cnt * m - pos_sum * inv_temp  # (TM, 1)
            return jnp.sum(row_total * valid), jnp.sum(pos_cnt)

        # v2t: vision anchors vs all text.  t2v: text anchors vs all vision
        # (match matrix is symmetric in the ids, so the same pm/nm apply).
        v2t, npairs = directional(v_tile, tn_ref)
        t2v, _ = directional(t_tile, vn_ref)

        # Lane-dense per-tile partials: [0,0,0]=v2t, [0,0,1]=t2v, [0,0,2]=npairs.
        lane = lax.broadcasted_iota(jnp.int32, (1, 8, 128), 2)
        sub = lax.broadcasted_iota(jnp.int32, (1, 8, 128), 1)
        vals = jnp.where(lane == 0, v2t,
               jnp.where(lane == 1, t2v,
               jnp.where(lane == 2, npairs, 0.0)))
        out_ref[...] = jnp.where(sub == 0, vals, 0.0)

    return kernel


# --------------------------------- wrapper -----------------------------------
def hard_negative_mining_contrastive_loss(
        vision_features, text_features, match_ids,
        temperature=0.07, hard_negative_factor=2.0,
        mining_strategy="semi-hard", block_rows=None,
        matmul_dtype=jnp.bfloat16, column_chunk=2048):
    """JAX/Pallas equivalent of HardNegativeMiningContrastiveLoss.forward.

    matmul_dtype=jnp.float32 gives bit-faithful parity with the PyTorch
    reference; the bf16 default trades ~1e-2 similarity precision for MXU rate
    (semi-hard window membership near the boundary may differ).
    """
    assert mining_strategy in ("semi-hard", "none")
    factor = float(hard_negative_factor) if mining_strategy == "semi-hard" else 1.0

    v = jnp.asarray(vision_features, jnp.float32)
    t = jnp.asarray(text_features, jnp.float32)
    ids = jnp.asarray(match_ids, jnp.int32)
    B, D = v.shape

    # --- per-generation anchor tile: 256 fills the v6e/v7x MXU rows; 128 on v5e-.
    if block_rows is None:
        try:
            kind = jax.devices()[0].device_kind.lower()
        except Exception:
            kind = ""
        tm = 128 if any(s in kind for s in ("v2", "v3", "v4", "v5")) else 256
    else:
        tm = int(block_rows)

    # --- pad B to a multiple of tm and D to a multiple of 128 (lane-dense K).
    b_pad = ((B + tm - 1) // tm) * tm
    d_pad = ((D + 127) // 128) * 128
    num_tiles = b_pad // tm
    v = jnp.pad(v, ((0, b_pad - B), (0, d_pad - D)))
    t = jnp.pad(t, ((0, b_pad - B), (0, d_pad - D)))
    ids_p = jnp.pad(ids, (0, b_pad - B))

    # --- L2-normalize (HBM-bandwidth bound): big row tiles, decoupled from tm.
    norm_rows = next(r for r in (1024, 512, 256, 128) if b_pad % r == 0)
    vn = _l2_normalize(v, matmul_dtype, norm_rows)
    tn = _l2_normalize(t, matmul_dtype, norm_rows)

    ids_row = ids_p.reshape(b_pad, 1)
    ids_col = ids_p.reshape(1, b_pad)

    # --- column chunk for the in-kernel online 3-pass reduction.
    cands = [c for c in (int(column_chunk), 2048, 1024, 512, 256, 128)
             if 0 < c <= b_pad and b_pad % c == 0]
    chunk = cands[0]

    kernel = _make_loss_kernel(temperature, factor, tm, chunk, B)

    # --- VMEM budget (per TensorCore).  Clamp to ~90% of real chip VMEM.
    itemsize = jnp.dtype(matmul_dtype).itemsize
    feat = b_pad * d_pad * itemsize

    def vmem_need(n_feat_bufs):
        resident = 2 * feat * n_feat_bufs              # vn + tn
        scratch = 2 * tm * b_pad * 4                   # s_scr + e_scr
        chunk_tmp = 12 * tm * chunk * 4 + 2 * chunk * d_pad * itemsize
        return resident + scratch + chunk_tmp + (2 << 20)

    try:
        info = pltpu.get_tpu_info()
        cap = int(0.9 * int(getattr(info, "vmem_capacity_bytes", 0))) or (64 << 20)
    except Exception:
        cap = 64 << 20                                 # conservative (v7x per-TC)

    def run(single_buffer):
        def res_spec(shape):
            # Grid-invariant (resident) operand: request 1-deep buffering.
            kw = {"pipeline_mode": pl.Buffered(1)} if single_buffer else {}
            return pl.BlockSpec(shape, lambda i: (0,) * len(shape), **kw)

        limit = int(min(max(vmem_need(1 if single_buffer else 2), 32 << 20), cap))
        return pl.pallas_call(
            kernel,
            out_shape=jax.ShapeDtypeStruct((num_tiles, 8, 128), jnp.float32),
            grid=(num_tiles,),
            in_specs=[
                res_spec((b_pad, d_pad)),                    # normalized vision
                res_spec((b_pad, d_pad)),                    # normalized text
                pl.BlockSpec((tm, 1), lambda i: (i, 0)),     # anchor-tile ids
                res_spec((1, b_pad)),                        # all ids
            ],
            out_specs=pl.BlockSpec((1, 8, 128), lambda i: (i, 0, 0)),
            scratch_shapes=[pltpu.VMEM((tm, b_pad), jnp.float32),   # sims slab
                            pltpu.VMEM((tm, b_pad), jnp.float32)],  # exp slab
            compiler_params=pltpu.CompilerParams(
                dimension_semantics=("parallel",),
                vmem_limit_bytes=limit),
        )(vn, tn, ids_row, ids_col)

    try:
        partials = run(hasattr(pl, "Buffered"))
    except Exception:
        partials = run(False)                # older jax / Buffered(1) rejected

    v2t_sum = jnp.sum(partials[:, 0, 0])
    t2v_sum = jnp.sum(partials[:, 0, 1])
    num_pos = jnp.sum(partials[:, 0, 2])     # exact pair count, accumulated in-kernel

    has_pairs = num_pos > 0.5
    denom = jnp.where(has_pairs, num_pos, 1.0)
    v2t_loss = jnp.where(has_pairs, v2t_sum / denom, 0.0)
    t2v_loss = jnp.where(has_pairs, t2v_sum / denom, 0.0)
    loss = (v2t_loss + t2v_loss) / 2.0
    return {
        "loss": loss,
        "v2t_loss": v2t_loss,
        "t2v_loss": t2v_loss,
        "hard_negative_factor": hard_negative_factor,
    }


# ----------------------------- reference (numpy, mirrors PyTorch) ------------
def _reference(vision, text, match_ids, temperature, factor):
    v = np.asarray(vision, np.float64)
    t = np.asarray(text, np.float64)
    v = v / np.maximum(np.linalg.norm(v, axis=1, keepdims=True), 1e-12)
    t = t / np.maximum(np.linalg.norm(t, axis=1, keepdims=True), 1e-12)
    sim = v @ t.T
    ids = np.asarray(match_ids)
    B = len(ids)
    match = np.equal.outer(ids, ids)

    def side(get_sims, get_mask):
        total = 0.0
        for i in range(B):
            mask_row = get_mask(i)
            pos = np.where(mask_row)[0]
            if len(pos) == 0:
                continue
            sims = get_sims(i)
            pos_sims = sims[pos]
            mp = pos_sims.mean()
            neg = np.where(~mask_row)[0]
            if len(neg) == 0:
                continue
            neg_sims = sims[neg]
            sh = (neg_sims < mp) & (neg_sims > mp - 0.2)
            w = np.ones_like(neg_sims)
            if sh.sum() > 0:
                w[sh] = factor
            pe = np.exp(pos_sims / temperature)
            ne = (np.exp(neg_sims / temperature) * w).sum()
            for p in pe:
                total += -np.log(p / (p + ne))
        return total

    v2t = side(lambda i: sim[i, :], lambda i: match[i, :])
    t2v = side(lambda i: sim[:, i], lambda i: match[:, i])
    npos = match.sum()
    if npos == 0:
        return 0.0, 0.0, 0.0
    v2t /= npos
    t2v /= npos
    return (v2t + t2v) / 2.0, v2t, t2v


if __name__ == "__main__":
    key = jax.random.PRNGKey(0)
    B, D = 8, 32
    k1, k2 = jax.random.split(key)
    vision = jax.random.normal(k1, (B, D), dtype=jnp.float32)
    text = jax.random.normal(k2, (B, D), dtype=jnp.float32)
    match_ids = jnp.array([0, 0, 1, 2, 2, 3, 4, 4], dtype=jnp.int32)

    # --- strict check: f32 matmul path vs the PyTorch-equivalent reference ---
    out = hard_negative_mining_contrastive_loss(
        vision, text, match_ids, temperature=0.07, hard_negative_factor=2.0,
        matmul_dtype=jnp.float32)
    loss = float(jax.block_until_ready(out["loss"]))

    ref_loss, ref_v2t, ref_t2v = _reference(
        np.asarray(vision), np.asarray(text), np.asarray(match_ids), 0.07, 2.0)

    assert np.allclose(loss, ref_loss, rtol=1e-4, atol=1e-4), \
        f"loss mismatch: {loss} vs {ref_loss}"
    assert np.allclose(float(out["v2t_loss"]), ref_v2t, rtol=1e-4, atol=1e-4)
    assert np.allclose(float(out["t2v_loss"]), ref_t2v, rtol=1e-4, atol=1e-4)

    # --- 'none' mining strategy (trace-time specialized, no semi-hard math) ---
    out_none = hard_negative_mining_contrastive_loss(
        vision, text, match_ids, temperature=0.07,
        mining_strategy="none", matmul_dtype=jnp.float32)
    loss_none = float(jax.block_until_ready(out_none["loss"]))
    ref_none, _, _ = _reference(
        np.asarray(vision), np.asarray(text), np.asarray(match_ids), 0.07, 1.0)
    assert np.allclose(loss_none, ref_none, rtol=1e-4, atol=1e-4), \
        f"'none' loss mismatch: {loss_none} vs {ref_none}"

    # --- fast default (bf16 MXU inputs): loose sanity check only ---
    out_bf16 = hard_negative_mining_contrastive_loss(
        vision, text, match_ids, temperature=0.07, hard_negative_factor=2.0)
    loss_bf16 = float(jax.block_until_ready(out_bf16["loss"]))
    assert np.isfinite(loss_bf16)
    assert abs(loss_bf16 - ref_loss) <= 0.1 * abs(ref_loss) + 0.02, \
        f"bf16 path too far off: {loss_bf16} vs {ref_loss}"

    print("KERNEL_OK")
</pallas_src>

<mosaic_0001>
module attributes {stable_mosaic.version = 11 : i64} {
  func.func @_normalize_kernel(%arg0: i32, %arg1: memref<256x128xf32, #tpu.memory_space<vmem>>, %arg2: memref<256x128xf32, #tpu.memory_space<vmem>>) attributes {dimension_semantics = [#tpu.dimension_semantics<parallel>], iteration_bounds = array<i64: 1>, scalar_prefetch = 0 : i64, scratch_operands = 0 : i64, tpu.core_type = #tpu.core_type<tc>, window_params = [{transform_indices = @transform_0, window_bounds = array<i64: 256, 128>}, {transform_indices = @transform_1, window_bounds = array<i64: 256, 128>}]} {
    %c0 = arith.constant 0 : index
    %c0_0 = arith.constant 0 : index
    %0 = vector.load %arg1[%c0, %c0_0] : memref<256x128xf32, #tpu.memory_space<vmem>>, vector<256x128xf32>
    %1 = arith.mulf %0, %0 : vector<256x128xf32>
    %cst = arith.constant dense<0.000000e+00> : vector<256xf32>
    %2 = vector.multi_reduction <add>, %1, %cst [1] : vector<256x128xf32> to vector<256xf32>
    %3 = vector.shape_cast %2 : vector<256xf32> to vector<256x1xf32>
    %cst_1 = arith.constant 1.000000e-24 : f32
    %4 = vector.broadcast %cst_1 : f32 to vector<256x1xf32>
    %5 = arith.maximumf %3, %4 : vector<256x1xf32>
    %6 = math.rsqrt %5 : vector<256x1xf32>
    %7 = vector.broadcast %6 : vector<256x1xf32> to vector<256x128xf32>
    %8 = arith.mulf %0, %7 : vector<256x128xf32>
    %c0_2 = arith.constant 0 : index
    %c0_3 = arith.constant 0 : index
    %9 = vector.load %arg2[%c0_2, %c0_3] : memref<256x128xf32, #tpu.memory_space<vmem>>, vector<256x128xf32>
    tpu.vector_store %arg2[%c0_2, %c0_3], %8 {strides = array<i32>} : memref<256x128xf32, #tpu.memory_space<vmem>>, vector<256x128xf32>,
    return
  }
  func.func @transform_0(%arg0: i32) -> (i32, i32) {
    %c0_i32 = arith.constant 0 : i32
    %c0_i32_0 = arith.constant 0 : i32
    return %arg0, %c0_i32 : i32, i32
  }
  func.func @transform_1(%arg0: i32) -> (i32, i32) {
    %c0_i32 = arith.constant 0 : i32
    %c0_i32_0 = arith.constant 0 : i32
    return %arg0, %c0_i32 : i32, i32
  }
}

</mosaic_0001>

<bundles_post_ra>
// kernel: tpu_custom_call.1
= control target key start
LH: loop header
LB: loop body
LE: loop exit
PB: predicated region body
PF: predicated region fallthrough
CT: control target
= control target key end

     0   :  { %6 = vsyncpa [#allocation3], 0  ;;  %s616_s0 = inlined_call_operand.hbm [shape: f32[256,128], index: 0, kind: input, shape index: {}]   ;;  %s617_s1 = inlined_call_operand.hbm [shape: f32[256,128], index: 1, kind: output, shape index: {}]  }
   0x1   :  { %7 = vsyncpa [#allocation4], 0  ;;  %s412_s6 = smov [#allocation2]   ;;  %s364_s10 = scalar_lea.hbm %s616_s0, 4096 }
   0x2   :  { %s13_s7 = sshll.u32 %s412_s6, 4  ;;  %p365_p0 = scmp.ne.s32.totalorder %s616_s0, %s364_s10  ;;  %s14_s7 = int_to_ptr.vmem [resolvable:$true] %s13_s7 }
   0x3   :  { %p368_p1 = scmp.lt.u32.totalorder %s364_s10, %s616_s0 }
   0x5   :  { %p370_p2 = pnand %p368_p1, %p365_p0 }
   0x7   :  { %373 = shalt.err (!%p370_p2)
}
   0x8   :  { %s374_s15 = scalar_lea.vmem %s14_s7, 4096  ;;  %p379_p4 = scmp.lt.s32.totalorder %s14_s7, %s14_s7 }
   0x9   :  { %p375_p3 = scmp.ne.s32.totalorder %s14_s7, %s374_s15  ;;  %p380_p5 = scmp.lt.s32.totalorder %s374_s15, %s374_s15 }
   0xb   :  { %p381_p6 = por %p380_p5, %p379_p4 }
   0xd   :  { %p382_p7 = pnand %p381_p6, %p375_p3 }
   0xf   :  { %385 = shalt.err (!%p382_p7)
}
  0x10   :  { %s413_s16 = smov 128   ;;  %s414_s17 = smov 8  }
  0x11   :  { %19 = dma.hbm_to_vmem [thread:$0]  %s616_s0, 4096, %s14_s7, [#allocation3], %s413_s16, %s413_s16, %s414_s17  }
  0x12   :  { %408 = dma.done.wait [#allocation3], 4096  }
  0x13   :  { %409 = vsyncadd [#allocation3], 4294963200  ;;  %v441_v0 = vld [vmem:[#allocation2 + $0x10] sm:$0xff]  ;;  %v443_v1 = vld [vmem:[#allocation2] sm:$0xff]  ;;  %s415_s0 = smov [#allocation5]  }
  0x14   :  { %v445_v2 = vld [vmem:[#allocation2 + $0x18] sm:$0xff]  ;;  %v57_v3 = vmul.f32 %v441_v0, %v441_v0  ;;  %v55_v4 = vmul.f32 %v443_v1, %v443_v1  ;;  %v451_v5 = vld [vmem:[#allocation2 + $0x8] sm:$0xff]  ;;  %v459_v9 = vld [vmem:[#allocation2 + $0x20] sm:$0xff]  ;;  %s284_s20 = sshll.u32 %s415_s0, 4  ;;  %s285_s20 = int_to_ptr.vmem [resolvable:$true] %s284_s20 }
  0x15   :  { %v58_v6 = vmul.f32 %v445_v2, %v445_v2  ;;  %v56_v7 = vmul.f32 %v451_v5, %v451_v5  ;;  %v457_v8 = vld [vmem:[#allocation2 + $0x28] sm:$0xff]  ;;  %v59_v11 = vmul.f32 %v459_v9, %v459_v9  ;;  %v465_v12 = vld [vmem:[#allocation2 + $0x38] sm:$0xff]  ;;  %v467_v13 = vld [vmem:[#allocation2 + $0x30] sm:$0xff]  ;;  %s386_s21 = scalar_lea.vmem %s285_s20, 4096  ;;  %p391_p9 = scmp.lt.s32.totalorder %s285_s20, %s285_s20 }
  0x16   :  { %91 = vadd.xlane.f32.xlu1 %v57_v3  ;;  %87 = vadd.xlane.f32.xlu0 %v55_v4  ;;  %v60_v10 = vmul.f32 %v457_v8, %v457_v8  ;;  %v62_v14 = vmul.f32 %v465_v12, %v465_v12  ;;  %v61_v15 = vmul.f32 %v467_v13, %v467_v13  ;;  %v473_v16 = vld [vmem:[#allocation2 + $0x48] sm:$0xff]  ;;  %v475_v17 = vld [vmem:[#allocation2 + $0x40] sm:$0xff]  ;;  %v481_v20 = vld [vmem:[#allocation2 + $0x58] sm:$0xff]  ;;  %p387_p8 = scmp.ne.s32.totalorder %s285_s20, %s386_s21  ;;  %p392_p10 = scmp.lt.s32.totalorder %s386_s21, %s386_s21 }
  0x17   :  { %v64_v18 = vmul.f32 %v473_v16, %v473_v16  ;;  %v63_v19 = vmul.f32 %v475_v17, %v475_v17  ;;  %v483_v21 = vld [vmem:[#allocation2 + $0x50] sm:$0xff]  ;;  %v66_v22 = vmul.f32 %v481_v20, %v481_v20  ;;  %v489_v24 = vld [vmem:[#allocation2 + $0x68] sm:$0xff]  ;;  %v491_v25 = vld [vmem:[#allocation2 + $0x60] sm:$0xff] }
  0x18   :  { %v65_v23 = vmul.f32 %v483_v21, %v483_v21  ;;  %v68_v26 = vmul.f32 %v489_v24, %v489_v24  ;;  %v67_v27 = vmul.f32 %v491_v25, %v491_v25  ;;  %v497_v28 = vld [vmem:[#allocation2 + $0x78] sm:$0xff]  ;;  %v499_v29 = vld [vmem:[#allocation2 + $0x70] sm:$0xff]  ;;  %v505_v32 = vld [vmem:[#allocation2 + $0x88] sm:$0xff]  ;;  %p393_p11 = por %p392_p10, %p391_p9 }
  0x19   :  { %v70_v30 = vmul.f32 %v497_v28, %v497_v28  ;;  %v69_v31 = vmul.f32 %v499_v29, %v499_v29  ;;  %v507_v33 = vld [vmem:[#allocation2 + $0x80] sm:$0xff]  ;;  %v72_v34 = vmul.f32 %v505_v32, %v505_v32  ;;  %v513_v36 = vld [vmem:[#allocation2 + $0x98] sm:$0xff]  ;;  %v515_v37 = vld [vmem:[#allocation2 + $0x90] sm:$0xff] }
  0x1a   :  { %93 = vadd.xlane.f32.xlu1 %v58_v6  ;;  %89 = vadd.xlane.f32.xlu0 %v56_v7  ;;  %v71_v35 = vmul.f32 %v507_v33, %v507_v33  ;;  %v74_v38 = vmul.f32 %v513_v36, %v513_v36  ;;  %v73_v39 = vmul.f32 %v515_v37, %v515_v37  ;;  %v521_v40 = vld [vmem:[#allocation2 + $0xa8] sm:$0xff]  ;;  %v523_v41 = vld [vmem:[#allocation2 + $0xa0] sm:$0xff]  ;;  %v529_v44 = vld [vmem:[#allocation2 + $0xb8] sm:$0xff]  ;;  %p394_p12 = pnand %p393_p11, %p387_p8 }
  0x1b   :  { %v76_v42 = vmul.f32 %v521_v40, %v521_v40  ;;  %v75_v43 = vmul.f32 %v523_v41, %v523_v41  ;;  %v531_v45 = vld [vmem:[#allocation2 + $0xb0] sm:$0xff]  ;;  %v78_v46 = vmul.f32 %v529_v44, %v529_v44  ;;  %v537_v48 = vld [vmem:[#allocation2 + $0xc8] sm:$0xff]  ;;  %v539_v49 = vld [vmem:[#allocation2 + $0xc0] sm:$0xff] }
  0x1c   :  { %v77_v47 = vmul.f32 %v531_v45, %v531_v45  ;;  %v80_v50 = vmul.f32 %v537_v48, %v537_v48  ;;  %v79_v51 = vmul.f32 %v539_v49, %v539_v49  ;;  %v545_v52 = vld [vmem:[#allocation2 + $0xd8] sm:$0xff]  ;;  %v547_v53 = vld [vmem:[#allocation2 + $0xd0] sm:$0xff]  ;;  %v553_v56 = vld [vmem:[#allocation2 + $0xe8] sm:$0xff] }
  0x1d   :  { %v82_v54 = vmul.f32 %v545_v52, %v545_v52  ;;  %v81_v55 = vmul.f32 %v547_v53, %v547_v53  ;;  %v555_v57 = vld [vmem:[#allocation2 + $0xe0] sm:$0xff]  ;;  %v84_v58 = vmul.f32 %v553_v56, %v553_v56  ;;  %v561_v60 = vld [vmem:[#allocation2 + $0xf8] sm:$0xff]  ;;  %v563_v61 = vld [vmem:[#allocation2 + $0xf0] sm:$0xff] }
  0x1e   :  { %97 = vadd.xlane.f32.xlu1 %v60_v10  ;;  %95 = vadd.xlane.f32.xlu0 %v59_v11  ;;  %v83_v59 = vmul.f32 %v555_v57, %v555_v57  ;;  %v86_v62 = vmul.f32 %v561_v60, %v561_v60  ;;  %v85_v63 = vmul.f32 %v563_v61, %v563_v61 }
  0x22   :  { %101 = vadd.xlane.f32.xlu1 %v62_v14  ;;  %99 = vadd.xlane.f32.xlu0 %v61_v15 }
  0x26   :  { %105 = vadd.xlane.f32.xlu1 %v64_v18  ;;  %103 = vadd.xlane.f32.xlu0 %v63_v19 }
  0x2a   :  { %109 = vadd.xlane.f32.xlu1 %v66_v22  ;;  %107 = vadd.xlane.f32.xlu0 %v65_v23 }
  0x2e   :  { %113 = vadd.xlane.f32.xlu1 %v68_v26  ;;  %111 = vadd.xlane.f32.xlu0 %v67_v27 }
  0x32   :  { %117 = vadd.xlane.f32.xlu1 %v70_v30  ;;  %115 = vadd.xlane.f32.xlu0 %v69_v31 }
  0x36   :  { %121 = vadd.xlane.f32.xlu1 %v72_v34  ;;  %119 = vadd.xlane.f32.xlu0 %v71_v35 }
  0x3a   :  { %125 = vadd.xlane.f32.xlu1 %v74_v38  ;;  %123 = vadd.xlane.f32.xlu0 %v73_v39 }
  0x3e   :  { %129 = vadd.xlane.f32.xlu1 %v76_v42  ;;  %127 = vadd.xlane.f32.xlu0 %v75_v43 }
  0x42   :  { %133 = vadd.xlane.f32.xlu1 %v78_v46  ;;  %131 = vadd.xlane.f32.xlu0 %v77_v47 }
  0x46   :  { %137 = vadd.xlane.f32.xlu1 %v80_v50  ;;  %135 = vadd.xlane.f32.xlu0 %v79_v51 }
  0x4a   :  { %141 = vadd.xlane.f32.xlu1 %v82_v54  ;;  %139 = vadd.xlane.f32.xlu0 %v81_v55 }
  0x4e   :  { %145 = vadd.xlane.f32.xlu1 %v84_v58  ;;  %143 = vadd.xlane.f32.xlu0 %v83_v59 }
  0x52   :  { %149 = vadd.xlane.f32.xlu1 %v86_v62  ;;  %147 = vadd.xlane.f32.xlu0 %v85_v63 }
  0xa3   :  { %v92_v3 = vpop.xlane.xlu1 %91  ;;  %v88_v4 = vpop.xlane.xlu0 %87 }
  0xa4   :  { %v153_v6 = vmax.f32 %v92_v3, 1e-24  ;;  %v151_v7 = vmax.f32 %v88_v4, 1e-24 }
  0xa6   :  { %300 = vrsqrt.f32 %v153_v6 }
  0xa7   :  { %302 = vrsqrt.f32 %v151_v7  ;;  %v94_v10 = vpop.xlane.xlu1 %93  ;;  %v90_v11 = vpop.xlane.xlu0 %89 }
  0xa8   :  { %v154_v14 = vmax.f32 %v94_v10, 1e-24  ;;  %v152_v15 = vmax.f32 %v90_v11, 1e-24 }
  0xaa   :  { %304 = vrsqrt.f32 %v154_v14 }
  0xab   :  { %306 = vrsqrt.f32 %v152_v15  ;;  %v98_v18 = vpop.xlane.xlu1 %97  ;;  %v96_v19 = vpop.xlane.xlu0 %95 }
  0xac   :  { %v156_v22 = vmax.f32 %v98_v18, 1e-24  ;;  %v155_v23 = vmax.f32 %v96_v19, 1e-24 }
  0xae   :  { %308 = vrsqrt.f32 %v156_v22 }
  0xaf   :  { %310 = vrsqrt.f32 %v155_v23  ;;  %v102_v26 = vpop.xlane.xlu1 %101  ;;  %v100_v27 = vpop.xlane.xlu0 %99 }
  0xb0   :  { %v301_v30 = vpop.eup %300  ;;  %v158_v31 = vmax.f32 %v102_v26, 1e-24  ;;  %v157_v34 = vmax.f32 %v100_v27, 1e-24 }
  0xb1   :  { %v303_v35 = vpop.eup %302  ;;  %v217_v38 = vmul.f32 %v301_v30, %v441_v0 }
  0xb2   :  { %v215_v39 = vmul.f32 %v303_v35, %v443_v1  ;;  %312 = vrsqrt.f32 %v158_v31 }
  0xb3   :  { %249 = vst [vmem:[#allocation5 + $0x10] sm:$0xff] %v217_v38  ;;  %314 = vrsqrt.f32 %v157_v34  ;;  %v106_v42 = vpop.xlane.xlu1 %105  ;;  %v104_v43 = vpop.xlane.xlu0 %103 }
  0xb4   :  { %v305_v46 = vpop.eup %304  ;;  %247 = vst [vmem:[#allocation5] sm:$0xff] %v215_v39  ;;  %v160_v47 = vmax.f32 %v106_v42, 1e-24  ;;  %v159_v50 = vmax.f32 %v104_v43, 1e-24 }
  0xb5   :  { %v307_v51 = vpop.eup %306  ;;  %v218_v54 = vmul.f32 %v305_v46, %v445_v2 }
  0xb6   :  { %v216_v55 = vmul.f32 %v307_v51, %v451_v5  ;;  %316 = vrsqrt.f32 %v160_v47 }
  0xb7   :  { %250 = vst [vmem:[#allocation5 + $0x18] sm:$0xff] %v218_v54  ;;  %318 = vrsqrt.f32 %v159_v50  ;;  %v110_v0 = vpop.xlane.xlu1 %109  ;;  %v108_v58 = vpop.xlane.xlu0 %107 }
  0xb8   :  { %v309_v1 = vpop.eup %308  ;;  %248 = vst [vmem:[#allocation5 + $0x8] sm:$0xff] %v216_v55  ;;  %v162_v59 = vmax.f32 %v110_v0, 1e-24  ;;  %v161_v62 = vmax.f32 %v108_v58, 1e-24 }
  0xb9   :  { %v311_v63 = vpop.eup %310  ;;  %v220_v3 = vmul.f32 %v309_v1, %v457_v8 }
  0xba   :  { %v219_v4 = vmul.f32 %v311_v63, %v459_v9  ;;  %320 = vrsqrt.f32 %v162_v59 }
  0xbb   :  { %252 = vst [vmem:[#allocation5 + $0x28] sm:$0xff] %v220_v3  ;;  %322 = vrsqrt.f32 %v161_v62  ;;  %v114_v2 = vpop.xlane.xlu1 %113  ;;  %v112_v6 = vpop.xlane.xlu0 %111 }
  0xbc   :  { %v313_v5 = vpop.eup %312  ;;  %251 = vst [vmem:[#allocation5 + $0x20] sm:$0xff] %v219_v4  ;;  %v164_v7 = vmax.f32 %v114_v2, 1e-24  ;;  %v163_v10 = vmax.f32 %v112_v6, 1e-24 }
  0xbd   :  { %v315_v11 = vpop.eup %314  ;;  %v222_v14 = vmul.f32 %v313_v5, %v465_v12 }
  0xbe   :  { %v221_v15 = vmul.f32 %v315_v11, %v467_v13  ;;  %324 = vrsqrt.f32 %v164_v7 }
  0xbf   :  { %254 = vst [vmem:[#allocation5 + $0x38] sm:$0xff] %v222_v14  ;;  %326 = vrsqrt.f32 %v163_v10  ;;  %v118_v8 = vpop.xlane.xlu1 %117  ;;  %v116_v18 = vpop.xlane.xlu0 %115 }
  0xc0   :  { %v317_v9 = vpop.eup %316  ;;  %253 = vst [vmem:[#allocation5 + $0x30] sm:$0xff] %v221_v15  ;;  %v166_v19 = vmax.f32 %v118_v8, 1e-24  ;;  %v165_v22 = vmax.f32 %v116_v18, 1e-24 }
  0xc1   :  { %v319_v23 = vpop.eup %318  ;;  %v224_v26 = vmul.f32 %v317_v9, %v473_v16 }
  0xc2   :  { %v223_v27 = vmul.f32 %v319_v23, %v475_v17  ;;  %328 = vrsqrt.f32 %v166_v19 }
  0xc3   :  { %256 = vst [vmem:[#allocation5 + $0x48] sm:$0xff] %v224_v26  ;;  %330 = vrsqrt.f32 %v165_v22  ;;  %v122_v12 = vpop.xlane.xlu1 %121  ;;  %v120_v30 = vpop.xlane.xlu0 %119 }
  0xc4   :  { %v321_v13 = vpop.eup %320  ;;  %255 = vst [vmem:[#allocation5 + $0x40] sm:$0xff] %v223_v27  ;;  %v168_v31 = vmax.f32 %v122_v12, 1e-24  ;;  %v167_v34 = vmax.f32 %v120_v30, 1e-24 }
  0xc5   :  { %v323_v35 = vpop.eup %322  ;;  %v226_v38 = vmul.f32 %v321_v13, %v481_v20 }
  0xc6   :  { %v225_v39 = vmul.f32 %v323_v35, %v483_v21  ;;  %332 = vrsqrt.f32 %v168_v31 }
  0xc7   :  { %258 = vst [vmem:[#allocation5 + $0x58] sm:$0xff] %v226_v38  ;;  %334 = vrsqrt.f32 %v167_v34  ;;  %v126_v16 = vpop.xlane.xlu1 %125  ;;  %v124_v42 = vpop.xlane.xlu0 %123 }
  0xc8   :  { %v325_v17 = vpop.eup %324  ;;  %257 = vst [vmem:[#allocation5 + $0x50] sm:$0xff] %v225_v39  ;;  %v170_v43 = vmax.f32 %v126_v16, 1e-24  ;;  %v169_v46 = vmax.f32 %v124_v42, 1e-24 }
  0xc9   :  { %v327_v47 = vpop.eup %326  ;;  %v228_v50 = vmul.f32 %v325_v17, %v489_v24 }
  0xca   :  { %v227_v51 = vmul.f32 %v327_v47, %v491_v25  ;;  %336 = vrsqrt.f32 %v170_v43 }
  0xcb   :  { %260 = vst [vmem:[#allocation5 + $0x68] sm:$0xff] %v228_v50  ;;  %338 = vrsqrt.f32 %v169_v46  ;;  %v130_v20 = vpop.xlane.xlu1 %129  ;;  %v128_v54 = vpop.xlane.xlu0 %127 }
  0xcc   :  { %v329_v21 = vpop.eup %328  ;;  %259 = vst [vmem:[#allocation5 + $0x60] sm:$0xff] %v227_v51  ;;  %v172_v55 = vmax.f32 %v130_v20, 1e-24  ;;  %v171_v0 = vmax.f32 %v128_v54, 1e-24 }
  0xcd   :  { %v331_v58 = vpop.eup %330  ;;  %v230_v1 = vmul.f32 %v329_v21, %v497_v28 }
  0xce   :  { %v229_v59 = vmul.f32 %v331_v58, %v499_v29  ;;  %340 = vrsqrt.f32 %v172_v55 }
  0xcf   :  { %262 = vst [vmem:[#allocation5 + $0x78] sm:$0xff] %v230_v1  ;;  %342 = vrsqrt.f32 %v171_v0  ;;  %v134_v24 = vpop.xlane.xlu1 %133  ;;  %v132_v62 = vpop.xlane.xlu0 %131 }
  0xd0   :  { %v333_v25 = vpop.eup %332  ;;  %261 = vst [vmem:[#allocation5 + $0x70] sm:$0xff] %v229_v59  ;;  %v174_v63 = vmax.f32 %v134_v24, 1e-24  ;;  %v173_v3 = vmax.f32 %v132_v62, 1e-24 }
  0xd1   :  { %v335_v4 = vpop.eup %334  ;;  %v232_v2 = vmul.f32 %v333_v25, %v505_v32 }
  0xd2   :  { %v231_v6 = vmul.f32 %v335_v4, %v507_v33  ;;  %344 = vrsqrt.f32 %v174_v63 }
  0xd3   :  { %264 = vst [vmem:[#allocation5 + $0x88] sm:$0xff] %v232_v2  ;;  %346 = vrsqrt.f32 %v173_v3  ;;  %v138_v28 = vpop.xlane.xlu1 %137  ;;  %v136_v5 = vpop.xlane.xlu0 %135 }
  0xd4   :  { %v337_v29 = vpop.eup %336  ;;  %263 = vst [vmem:[#allocation5 + $0x80] sm:$0xff] %v231_v6  ;;  %v176_v7 = vmax.f32 %v138_v28, 1e-24  ;;  %v175_v10 = vmax.f32 %v136_v5, 1e-24 }
  0xd5   :  { %v339_v11 = vpop.eup %338  ;;  %v234_v14 = vmul.f32 %v337_v29, %v513_v36 }
  0xd6   :  { %v233_v15 = vmul.f32 %v339_v11, %v515_v37  ;;  %348 = vrsqrt.f32 %v176_v7 }
  0xd7   :  { %266 = vst [vmem:[#allocation5 + $0x98] sm:$0xff] %v234_v14  ;;  %350 = vrsqrt.f32 %v175_v10  ;;  %v142_v32 = vpop.xlane.xlu1 %141  ;;  %v140_v8 = vpop.xlane.xlu0 %139 }
  0xd8   :  { %v341_v33 = vpop.eup %340  ;;  %265 = vst [vmem:[#allocation5 + $0x90] sm:$0xff] %v233_v15  ;;  %v178_v18 = vmax.f32 %v142_v32, 1e-24  ;;  %v177_v9 = vmax.f32 %v140_v8, 1e-24 }
  0xd9   :  { %v343_v19 = vpop.eup %342  ;;  %v236_v22 = vmul.f32 %v341_v33, %v521_v40 }
  0xda   :  { %v235_v23 = vmul.f32 %v343_v19, %v523_v41  ;;  %352 = vrsqrt.f32 %v178_v18 }
  0xdb   :  { %268 = vst [vmem:[#allocation5 + $0xa8] sm:$0xff] %v236_v22  ;;  %354 = vrsqrt.f32 %v177_v9  ;;  %v146_v36 = vpop.xlane.xlu1 %145  ;;  %v144_v26 = vpop.xlane.xlu0 %143 }
  0xdc   :  { %v345_v37 = vpop.eup %344  ;;  %267 = vst [vmem:[#allocation5 + $0xa0] sm:$0xff] %v235_v23  ;;  %v180_v27 = vmax.f32 %v146_v36, 1e-24  ;;  %v179_v12 = vmax.f32 %v144_v26, 1e-24 }
  0xdd   :  { %v347_v30 = vpop.eup %346  ;;  %v238_v13 = vmul.f32 %v345_v37, %v529_v44 }
  0xde   :  { %v237_v31 = vmul.f32 %v347_v30, %v531_v45  ;;  %356 = vrsqrt.f32 %v180_v27 }
  0xdf   :  { %270 = vst [vmem:[#allocation5 + $0xb8] sm:$0xff] %v238_v13  ;;  %358 = vrsqrt.f32 %v179_v12  ;;  %v150_v40 = vpop.xlane.xlu1 %149  ;;  %v148_v34 = vpop.xlane.xlu0 %147 }
  0xe0   :  { %v349_v41 = vpop.eup %348  ;;  %269 = vst [vmem:[#allocation5 + $0xb0] sm:$0xff] %v237_v31  ;;  %v182_v35 = vmax.f32 %v150_v40, 1e-24  ;;  %v181_v38 = vmax.f32 %v148_v34, 1e-24 }
  0xe1   :  { %v351_v39 = vpop.eup %350  ;;  %v240_v16 = vmul.f32 %v349_v41, %v537_v48 }
  0xe2   :  { %v239_v42 = vmul.f32 %v351_v39, %v539_v49  ;;  %360 = vrsqrt.f32 %v182_v35 }
  0xe3   :  { %272 = vst [vmem:[#allocation5 + $0xc8] sm:$0xff] %v240_v16  ;;  %362 = vrsqrt.f32 %v181_v38 }
  0xe4   :  { %v353_v44 = vpop.eup %352  ;;  %271 = vst [vmem:[#allocation5 + $0xc0] sm:$0xff] %v239_v42 }
  0xe5   :  { %v355_v45 = vpop.eup %354  ;;  %v242_v17 = vmul.f32 %v353_v44, %v545_v52 }
  0xe6   :  { %v241_v43 = vmul.f32 %v355_v45, %v547_v53 }
  0xe7   :  { %274 = vst [vmem:[#allocation5 + $0xd8] sm:$0xff] %v242_v17 }
  0xe8   :  { %v357_v46 = vpop.eup %356  ;;  %273 = vst [vmem:[#allocation5 + $0xd0] sm:$0xff] %v241_v43 }
  0xe9   :  { %v359_v47 = vpop.eup %358  ;;  %v244_v50 = vmul.f32 %v357_v46, %v553_v56 }
  0xea   :  { %v243_v48 = vmul.f32 %v359_v47, %v555_v57 }
  0xeb   :  { %276 = vst [vmem:[#allocation5 + $0xe8] sm:$0xff] %v244_v50 }
  0xec   :  { %v361_v49 = vpop.eup %360  ;;  %275 = vst [vmem:[#allocation5 + $0xe0] sm:$0xff] %v243_v48 }
  0xed   :  { %v363_v51 = vpop.eup %362  ;;  %v246_v20 = vmul.f32 %v361_v49, %v561_v60 }
  0xee   :  { %v245_v52 = vmul.f32 %v363_v51, %v563_v61 }
  0xef   :  { %278 = vst [vmem:[#allocation5 + $0xf8] sm:$0xff] %v246_v20 }
  0xf0   :  { %277 = vst [vmem:[#allocation5 + $0xf0] sm:$0xff] %v245_v52 }
  0xf1   :  { %397 = shalt.err (!%p394_p12)
}
  0xf2   :  { %s398_s24 = scalar_lea.hbm %s617_s1, 4096 }
  0xf3   :  { %p399_p13 = scmp.ne.s32.totalorder %s617_s1, %s398_s24  ;;  %p402_p0 = scmp.lt.u32.totalorder %s398_s24, %s617_s1 }
  0xf5   :  { %p404_p1 = pnand %p402_p0, %p399_p13 }
  0xf7   :  { %407 = shalt.err (!%p404_p1)
}
  0xf8   :  { %290 = dma.vmem_to_hbm [thread:$0]  %s285_s20, 4096, %s617_s1, [#allocation4], %s413_s16, %s413_s16, %s414_s17  }
  0xf9   :  { %410 = dma.done.wait [#allocation4], 4096  }
  0xfa   :  { %411 = vsyncadd [#allocation4], 4294963200 }
  0xfb   :  { %294 = vsyncpa [#allocation3], 1 }
  0xfc   :  { %295 = vsyncpa [#allocation4], 1 }

</bundles_post_ra>
